<compile_context>
chip_gen: v6e
topology: v6e:2x2x1
jax: 0.10.0
libtpu: 0.0.40
codegen_flags: <defaults>
</compile_context>

<pallas_src>
import math
import functools

import jax
import jax.numpy as jnp
from jax import lax
from jax.experimental import pallas as pl
from jax.experimental.pallas import tpu as pltpu


def _sim_matrix_kernel(q_ref, k_ref, w_ref, bq_ref, o_ref, *,
                       batch, seq, heads_per_group, head_dim, group_width, scale):
    # q_ref/k_ref : (B*S, D)   f32 query / key activations (all batches, constant over grid)
    # w_ref       : (D, 2*GW)  bf16 per-group weights, columns = [Wq_g | Wk_g]
    # bq_ref      : (1, GW)    f32 query bias for this head group
    # o_ref       : (B, HPG, S, S) similarity matrices for this head group
    xq = q_ref[...].astype(jnp.bfloat16)                       # (B*S, D)
    xk = k_ref[...].astype(jnp.bfloat16)
    w = w_ref[...]                                             # (D, 2*GW) bf16

    # Projections for this head group: one MXU matmul per side, f32 accumulation.
    q = jnp.dot(xq, w[:, :group_width],
                preferred_element_type=jnp.float32) + bq_ref[...]   # (B*S, GW)
    k = jnp.dot(xk, w[:, group_width:],
                preferred_element_type=jnp.float32)                 # (B*S, GW), bk dropped

    inv_scale = 1.0 / scale
    per_batch = []
    for b in range(batch):                                     # static unroll (B = 2)
        qb = q[b * seq:(b + 1) * seq]                          # (S, GW), 8-sublane aligned
        kb = k[b * seq:(b + 1) * seq]
        per_head = []
        for h in range(heads_per_group):                       # static unroll (HPG = 2)
            lo = h * head_dim
            qh = qb[:, lo:lo + head_dim]                       # (S, hd), 128-lane aligned
            kh = kb[:, lo:lo + head_dim]
            # q @ k^T contracting on head_dim directly (no materialized transpose)
            s = lax.dot_general(qh, kh,
                                dimension_numbers=(((1,), (1,)), ((), ())),
                                preferred_element_type=jnp.float32)
            per_head.append(s * inv_scale)
        per_batch.append(jnp.stack(per_head, axis=0))          # (HPG, S, S)
    scores = jnp.stack(per_batch, axis=0)                      # (B, HPG, S, S)

    # Numerically-stable exact softmax over the last axis (dropout p=0 -> identity).
    scores = scores - jnp.max(scores, axis=-1, keepdims=True)
    e = jnp.exp(scores)
    probs = e / jnp.sum(e, axis=-1, keepdims=True)

    o_ref[...] = probs.astype(o_ref.dtype)                     # single store per group


def prepare_params(wq, bq, wk, *, num_heads, num_groups=2):
    """One-time (model init) parameter prep — NOT per call.

    torch nn.Linear weights are (out, in); we transpose once to (in, out), slice per head
    group, concatenate each group's [Wq_g | Wk_g] columns, and cast to bf16.
    bk is intentionally omitted: the row softmax is invariant to the key bias.
    """
    model_dim, d = wq.shape
    assert num_heads % num_groups == 0
    head_dim = model_dim // num_heads
    group_width = (num_heads // num_groups) * head_dim

    wq_t = wq.T                                               # (D, model_dim)
    wk_t = wk.T
    blocks = []
    for g in range(num_groups):
        cols = slice(g * group_width, (g + 1) * group_width)
        blocks.append(wq_t[:, cols])
        blocks.append(wk_t[:, cols])
    w_cat = jnp.concatenate(blocks, axis=1).astype(jnp.bfloat16)   # (D, 2*model_dim)
    bq_r = bq.reshape(1, model_dim).astype(jnp.float32)            # (1, model_dim)
    return w_cat, bq_r


def similarity_matrix(query, key, w_cat, bq_r, *, num_heads, num_groups=2):
    """query, key: (B, S, D) f32. w_cat/bq_r from prepare_params. Returns (B, H, S, S) f32."""
    B, S, D = query.shape
    model_dim = bq_r.shape[1]
    head_dim = model_dim // num_heads
    hpg = num_heads // num_groups
    group_width = hpg * head_dim

    # Free reshapes of contiguous activations (no transpose, no per-call weight work).
    q2d = query.reshape(B * S, D)
    k2d = key.reshape(B * S, D)

    kernel = functools.partial(
        _sim_matrix_kernel, batch=B, seq=S, heads_per_group=hpg,
        head_dim=head_dim, group_width=group_width, scale=math.sqrt(64.0))

    # Advisory cost hint so XLA does not over-serialize around this tiny custom call.
    flops = 2 * 2 * B * S * D * model_dim + 2 * B * num_heads * S * S * head_dim
    transcendentals = B * num_heads * S * S
    bytes_accessed = (2 * B * S * D * 4            # f32 activations
                      + D * 2 * model_dim * 2      # bf16 fused weights
                      + model_dim * 4              # bias
                      + B * num_heads * S * S * 4) # output

    return pl.pallas_call(
        kernel,
        out_shape=jax.ShapeDtypeStruct((B, num_heads, S, S), jnp.float32),
        grid=(num_groups,),
        in_specs=[
            pl.BlockSpec((B * S, D), lambda g: (0, 0)),              # query (shared, fetched once)
            pl.BlockSpec((B * S, D), lambda g: (0, 0)),              # key   (shared, fetched once)
            pl.BlockSpec((D, 2 * group_width), lambda g: (0, g)),    # [Wq_g | Wk_g] for this group
            pl.BlockSpec((1, group_width), lambda g: (0, g)),        # bq_g
        ],
        out_specs=pl.BlockSpec((B, hpg, S, S), lambda g: (0, g, 0, 0)),
        compiler_params=pltpu.CompilerParams(
            dimension_semantics=("parallel",)),   # v7x: each TC gets disjoint weight columns
        cost_estimate=pl.CostEstimate(flops=flops,
                                      transcendentals=transcendentals,
                                      bytes_accessed=bytes_accessed),
    )(q2d, k2d, w_cat, bq_r)


def _reference(query, key, wq, bq, wk, bk, num_heads):
    """Pure-JAX f32 reference matching the PyTorch module (includes bk)."""
    B, S, D = query.shape
    model_dim = wq.shape[0]
    hd = model_dim // num_heads
    q = query @ wq.T + bq
    k = key @ wk.T + bk
    q = q.reshape(B, S, num_heads, hd).transpose(0, 2, 1, 3)
    k = k.reshape(B, S, num_heads, hd).transpose(0, 2, 1, 3)
    scores = jnp.einsum("bhsd,bhtd->bhst", q, k) / math.sqrt(64.0)
    return jax.nn.softmax(scores, axis=-1)


if __name__ == "__main__":
    # Module constants (Similarity_matrix.__init__): input_size=512, model_dim=512, heads=4.
    B, S, D = 2, 8, 512
    NUM_HEADS, MODEL_DIM = 4, 512

    key0 = jax.random.PRNGKey(0)
    k_q, k_k, k_wq, k_wk, k_bq, k_bk, k_v = jax.random.split(key0, 7)

    query = jax.random.normal(k_q, (B, S, D), dtype=jnp.float32)
    key_in = jax.random.normal(k_k, (B, S, D), dtype=jnp.float32)
    value = jax.random.normal(k_v, (B, S, D), dtype=jnp.float32)  # linear_v never affects the output

    # Deterministic synthetic parameters (torch nn.Linear weight layout: (out, in)).
    wq = jax.random.normal(k_wq, (MODEL_DIM, D), dtype=jnp.float32) * 0.02
    wk = jax.random.normal(k_wk, (MODEL_DIM, D), dtype=jnp.float32) * 0.02
    bq = jax.random.normal(k_bq, (MODEL_DIM,), dtype=jnp.float32) * 0.02
    bk = jax.random.normal(k_bk, (MODEL_DIM,), dtype=jnp.float32) * 0.02

    # One-time init: transpose/concat/cast weights (done once, not per forward call).
    w_cat, bq_r = prepare_params(wq, bq, wk, num_heads=NUM_HEADS)

    out = similarity_matrix(query, key_in, w_cat, bq_r, num_heads=NUM_HEADS)
    out = jax.block_until_ready(out)

    ref = _reference(query, key_in, wq, bq, wk, bk, NUM_HEADS)
    assert out.shape == (B, NUM_HEADS, S, S), out.shape
    # Tolerance accounts only for bf16 weight/activation quantization (softmax itself is exact f32).
    assert jnp.allclose(out, ref, atol=2e-3, rtol=2e-3), float(jnp.max(jnp.abs(out - ref)))

    print("KERNEL_OK")
</pallas_src>

<mosaic_0001>
module attributes {stable_mosaic.version = 11 : i64} {
  func.func @_sim_matrix_kernel(%arg0: i32, %arg1: memref<16x512xf32, #tpu.memory_space<vmem>>, %arg2: memref<16x512xf32, #tpu.memory_space<vmem>>, %arg3: memref<512x512xbf16, #tpu.memory_space<vmem>>, %arg4: memref<1x256xf32, #tpu.memory_space<vmem>>, %arg5: memref<2x2x8x8xf32, #tpu.memory_space<vmem>>) attributes {dimension_semantics = [#tpu.dimension_semantics<parallel>], iteration_bounds = array<i64: 2>, scalar_prefetch = 0 : i64, scratch_operands = 0 : i64, tpu.core_type = #tpu.core_type<tc>, window_params = [{pipeline_mode = #tpu.pipeline_mode<synchronous>, transform_indices = @transform_0, window_bounds = array<i64: 16, 512>}, {pipeline_mode = #tpu.pipeline_mode<synchronous>, transform_indices = @transform_1, window_bounds = array<i64: 16, 512>}, {transform_indices = @transform_2, window_bounds = array<i64: 512, 512>}, {transform_indices = @transform_3, window_bounds = array<i64: 1, 256>}, {transform_indices = @transform_4, window_bounds = array<i64: 2, 2, 8, 8>}]} {
    %c0 = arith.constant 0 : index
    %c0_0 = arith.constant 0 : index
    %0 = vector.load %arg1[%c0, %c0_0] : memref<16x512xf32, #tpu.memory_space<vmem>>, vector<16x512xf32>
    %1 = arith.truncf %0 : vector<16x512xf32> to vector<16x512xbf16>
    %c0_1 = arith.constant 0 : index
    %c0_2 = arith.constant 0 : index
    %2 = vector.load %arg2[%c0_1, %c0_2] : memref<16x512xf32, #tpu.memory_space<vmem>>, vector<16x512xf32>
    %3 = arith.truncf %2 : vector<16x512xf32> to vector<16x512xbf16>
    %c0_3 = arith.constant 0 : index
    %c0_4 = arith.constant 0 : index
    %4 = vector.load %arg3[%c0_3, %c0_4] : memref<512x512xbf16, #tpu.memory_space<vmem>>, vector<512x512xbf16>
    %5 = vector.extract_strided_slice %4 {offsets = [0, 0], sizes = [512, 256], strides = [1, 1]} : vector<512x512xbf16> to vector<512x256xbf16>
    %cst = arith.constant dense<0.000000e+00> : vector<16x256xf32>
    %6 = tpu.matmul %1, %5, %cst {dimension_numbers = #tpu.dot_dimension_numbers<[1], [0], [0], [1], [0, 0, 1, 1], [], []>} : vector<16x512xbf16>, vector<512x256xbf16>, vector<16x256xf32> -> vector<16x256xf32>
    %c0_5 = arith.constant 0 : index
    %c0_6 = arith.constant 0 : index
    %7 = vector.load %arg4[%c0_5, %c0_6] : memref<1x256xf32, #tpu.memory_space<vmem>>, vector<1x256xf32>
    %8 = vector.broadcast %7 : vector<1x256xf32> to vector<16x256xf32>
    %9 = arith.addf %6, %8 : vector<16x256xf32>
    %10 = vector.extract_strided_slice %4 {offsets = [0, 256], sizes = [512, 256], strides = [1, 1]} : vector<512x512xbf16> to vector<512x256xbf16>
    %cst_7 = arith.constant dense<0.000000e+00> : vector<16x256xf32>
    %11 = tpu.matmul %3, %10, %cst_7 {dimension_numbers = #tpu.dot_dimension_numbers<[1], [0], [0], [1], [0, 0, 1, 1], [], []>} : vector<16x512xbf16>, vector<512x256xbf16>, vector<16x256xf32> -> vector<16x256xf32>
    %12 = vector.extract_strided_slice %9 {offsets = [0, 0], sizes = [8, 256], strides = [1, 1]} : vector<16x256xf32> to vector<8x256xf32>
    %13 = vector.extract_strided_slice %11 {offsets = [0, 0], sizes = [8, 256], strides = [1, 1]} : vector<16x256xf32> to vector<8x256xf32>
    %14 = vector.extract_strided_slice %12 {offsets = [0, 0], sizes = [8, 128], strides = [1, 1]} : vector<8x256xf32> to vector<8x128xf32>
    %15 = vector.extract_strided_slice %13 {offsets = [0, 0], sizes = [8, 128], strides = [1, 1]} : vector<8x256xf32> to vector<8x128xf32>
    %cst_8 = arith.constant dense<0.000000e+00> : vector<8x8xf32>
    %16 = tpu.matmul %14, %15, %cst_8 {dimension_numbers = #tpu.dot_dimension_numbers<[1], [1], [0], [0], [0, 0, 1, 0], [], []>} : vector<8x128xf32>, vector<8x128xf32>, vector<8x8xf32> -> vector<8x8xf32>
    %cst_9 = arith.constant 1.250000e-01 : f32
    %17 = vector.broadcast %cst_9 : f32 to vector<8x8xf32>
    %18 = arith.mulf %16, %17 : vector<8x8xf32>
    %19 = vector.extract_strided_slice %12 {offsets = [0, 128], sizes = [8, 128], strides = [1, 1]} : vector<8x256xf32> to vector<8x128xf32>
    %20 = vector.extract_strided_slice %13 {offsets = [0, 128], sizes = [8, 128], strides = [1, 1]} : vector<8x256xf32> to vector<8x128xf32>
    %cst_10 = arith.constant dense<0.000000e+00> : vector<8x8xf32>
    %21 = tpu.matmul %19, %20, %cst_10 {dimension_numbers = #tpu.dot_dimension_numbers<[1], [1], [0], [0], [0, 0, 1, 0], [], []>} : vector<8x128xf32>, vector<8x128xf32>, vector<8x8xf32> -> vector<8x8xf32>
    %cst_11 = arith.constant 1.250000e-01 : f32
    %22 = vector.broadcast %cst_11 : f32 to vector<8x8xf32>
    %23 = arith.mulf %21, %22 : vector<8x8xf32>
    %24 = vector.shape_cast %18 : vector<8x8xf32> to vector<1x8x8xf32>
    %25 = vector.shape_cast %23 : vector<8x8xf32> to vector<1x8x8xf32>
    %26 = tpu.concatenate %24, %25 in 0 : vector<1x8x8xf32>, vector<1x8x8xf32> -> vector<2x8x8xf32>
    %27 = vector.extract_strided_slice %9 {offsets = [8, 0], sizes = [8, 256], strides = [1, 1]} : vector<16x256xf32> to vector<8x256xf32>
    %28 = vector.extract_strided_slice %11 {offsets = [8, 0], sizes = [8, 256], strides = [1, 1]} : vector<16x256xf32> to vector<8x256xf32>
    %29 = vector.extract_strided_slice %27 {offsets = [0, 0], sizes = [8, 128], strides = [1, 1]} : vector<8x256xf32> to vector<8x128xf32>
    %30 = vector.extract_strided_slice %28 {offsets = [0, 0], sizes = [8, 128], strides = [1, 1]} : vector<8x256xf32> to vector<8x128xf32>
    %cst_12 = arith.constant dense<0.000000e+00> : vector<8x8xf32>
    %31 = tpu.matmul %29, %30, %cst_12 {dimension_numbers = #tpu.dot_dimension_numbers<[1], [1], [0], [0], [0, 0, 1, 0], [], []>} : vector<8x128xf32>, vector<8x128xf32>, vector<8x8xf32> -> vector<8x8xf32>
    %cst_13 = arith.constant 1.250000e-01 : f32
    %32 = vector.broadcast %cst_13 : f32 to vector<8x8xf32>
    %33 = arith.mulf %31, %32 : vector<8x8xf32>
    %34 = vector.extract_strided_slice %27 {offsets = [0, 128], sizes = [8, 128], strides = [1, 1]} : vector<8x256xf32> to vector<8x128xf32>
    %35 = vector.extract_strided_slice %28 {offsets = [0, 128], sizes = [8, 128], strides = [1, 1]} : vector<8x256xf32> to vector<8x128xf32>
    %cst_14 = arith.constant dense<0.000000e+00> : vector<8x8xf32>
    %36 = tpu.matmul %34, %35, %cst_14 {dimension_numbers = #tpu.dot_dimension_numbers<[1], [1], [0], [0], [0, 0, 1, 0], [], []>} : vector<8x128xf32>, vector<8x128xf32>, vector<8x8xf32> -> vector<8x8xf32>
    %cst_15 = arith.constant 1.250000e-01 : f32
    %37 = vector.broadcast %cst_15 : f32 to vector<8x8xf32>
    %38 = arith.mulf %36, %37 : vector<8x8xf32>
    %39 = vector.shape_cast %33 : vector<8x8xf32> to vector<1x8x8xf32>
    %40 = vector.shape_cast %38 : vector<8x8xf32> to vector<1x8x8xf32>
    %41 = tpu.concatenate %39, %40 in 0 : vector<1x8x8xf32>, vector<1x8x8xf32> -> vector<2x8x8xf32>
    %42 = vector.shape_cast %26 : vector<2x8x8xf32> to vector<1x2x8x8xf32>
    %43 = vector.shape_cast %41 : vector<2x8x8xf32> to vector<1x2x8x8xf32>
    %44 = tpu.concatenate %42, %43 in 0 : vector<1x2x8x8xf32>, vector<1x2x8x8xf32> -> vector<2x2x8x8xf32>
    %cst_16 = arith.constant dense<0xFF800000> : vector<2x2x8xf32>
    %45 = vector.multi_reduction <maximumf>, %44, %cst_16 [3] : vector<2x2x8x8xf32> to vector<2x2x8xf32>
    %46 = vector.shape_cast %45 : vector<2x2x8xf32> to vector<2x2x8x1xf32>
    %47 = vector.broadcast %46 : vector<2x2x8x1xf32> to vector<2x2x8x8xf32>
    %48 = arith.subf %44, %47 : vector<2x2x8x8xf32>
    %49 = math.exp %48 : vector<2x2x8x8xf32>
    %cst_17 = arith.constant dense<0.000000e+00> : vector<2x2x8xf32>
    %50 = vector.multi_reduction <add>, %49, %cst_17 [3] : vector<2x2x8x8xf32> to vector<2x2x8xf32>
    %51 = vector.shape_cast %50 : vector<2x2x8xf32> to vector<2x2x8x1xf32>
    %52 = vector.broadcast %51 : vector<2x2x8x1xf32> to vector<2x2x8x8xf32>
    %53 = arith.divf %49, %52 : vector<2x2x8x8xf32>
    %c0_18 = arith.constant 0 : index
    %c0_19 = arith.constant 0 : index
    %c0_20 = arith.constant 0 : index
    %c0_21 = arith.constant 0 : index
    %54 = vector.load %arg5[%c0_18, %c0_19, %c0_20, %c0_21] : memref<2x2x8x8xf32, #tpu.memory_space<vmem>>, vector<2x2x8x8xf32>
    tpu.vector_store %arg5[%c0_18, %c0_19, %c0_20, %c0_21], %53 {strides = array<i32>} : memref<2x2x8x8xf32, #tpu.memory_space<vmem>>, vector<2x2x8x8xf32>,
    return
  }
  func.func @transform_0(%arg0: i32) -> (i32, i32) {
    %c0_i32 = arith.constant 0 : i32
    %c0_i32_0 = arith.constant 0 : i32
    %c0_i32_1 = arith.constant 0 : i32
    return %c0_i32, %c0_i32_0 : i32, i32
  }
  func.func @transform_1(%arg0: i32) -> (i32, i32) {
    %c0_i32 = arith.constant 0 : i32
    %c0_i32_0 = arith.constant 0 : i32
    %c0_i32_1 = arith.constant 0 : i32
    return %c0_i32, %c0_i32_0 : i32, i32
  }
  func.func @transform_2(%arg0: i32) -> (i32, i32) {
    %c0_i32 = arith.constant 0 : i32
    %c0_i32_0 = arith.constant 0 : i32
    return %c0_i32, %arg0 : i32, i32
  }
  func.func @transform_3(%arg0: i32) -> (i32, i32) {
    %c0_i32 = arith.constant 0 : i32
    %c0_i32_0 = arith.constant 0 : i32
    return %c0_i32, %arg0 : i32, i32
  }
  func.func @transform_4(%arg0: i32) -> (i32, i32, i32, i32) {
    %c0_i32 = arith.constant 0 : i32
    %c0_i32_0 = arith.constant 0 : i32
    %c0_i32_1 = arith.constant 0 : i32
    %c0_i32_2 = arith.constant 0 : i32
    return %c0_i32, %arg0, %c0_i32_0, %c0_i32_1 : i32, i32, i32, i32
  }
}

</mosaic_0001>

<bundles_post_ra>
// kernel: tpu_custom_call.1
= control target key start
LH: loop header
LB: loop body
LE: loop exit
PB: predicated region body
PF: predicated region fallthrough
CT: control target
= control target key end

     0   :  { %9 = vsyncpa [#allocation3], 0  ;;  %s2694_s0 = inlined_call_operand.hbm [shape: f32[16,512], index: 0, kind: input, shape index: {}]   ;;  %s2695_s1 = inlined_call_operand.hbm [shape: f32[16,512], index: 1, kind: input, shape index: {}]   ;;  %s2696_s2 = inlined_call_operand.hbm [shape: bf16[512,1024], index: 2, kind: input, shape index: {}]   ;;  %s2697_s3 = inlined_call_operand.vmem [shape: f32[1,512], index: 3, kind: input, shape index: {}]   ;;  %s2698_s4 = inlined_call_operand.hbm [shape: f32[2,4,8,8], index: 4, kind: output, shape index: {}]  }
   0x1   :  { %10 = vsyncpa [#allocation6], 0 }
   0x2   :  { %11 = vsyncpa [#allocation4], 0 }
   0x3   :  { %13 = vsyncpa [#allocation4 + $0x1], 0  ;;  %s2351_s15 = smov 0   ;;  %s2353_s16 = smov 0  }
   0x4   :  { %s2355_s17 = smov 0   ;;  %s2357_s18 = smov 0  }
   0x5 LB: > { %s2372_s19 = sadd.s32 4294967295, %s2308_s18   ;;  %s1711_s20 = sadd.s32 4294967294, %s2308_s18   ;;  %s2308_s18 = sphi %s2357_s18, %s2722_s18   ;;  %s2304_s17 = sphi %s2355_s17, %s2721_s17   ;;  %s2300_s16 = sphi %s2353_s16, %s2720_s16   ;;  %s2296_s15 = sphi %s2351_s15, %s2719_s15  }
   0x6   : > { %s2376_s21 = sadd.s32 1, %s2308_s18   ;;  %s68_s22 = sadd.s32 1, %s2304_s17 }
   0x7   : > { %s65_s23 = ssub.s32 %s2308_s18, %s2376_s21  ;;  %p75_p0 = scmp.ne.s32.totalorder %s2304_s17, %s2300_s16 }
   0x8   : > { %p66_p1 = scmp.eq.s32.totalorder %s65_s23, 0  ;;  %p76_p2 = scmp.eq.s32.totalorder %s2308_s18, 0 }
   0x9   : > { %p81_p3 = scmp.ne.s32.totalorder %s2300_s16, %s2296_s15  ;;  %p2700_p4 = scmp.eq.s32.totalorder %s2372_s19, 0 }
   0xa   : > { %s2388_s24 = scalar_select %p66_p1, %s2304_s17, %s68_s22  }
   0xb   : > { %p2390_p5 = por %p76_p2, %p75_p0  ;;  %p2396_p6 = por %p2700_p4, %p81_p3 }
   0xc   : > { %p131_p7 = scmp.eq.s32.totalorder %s2372_s19, 1  ;;  %p137_p8 = scmp.eq.s32.totalorder %s1711_s20, 1 }
   0xd   : > { %s2704_s26 = scalar_select %p2396_p6, 1, 0 }
   0xe   : > { %p1712_p9 = scmp.ge.s32.totalorder %s2308_s18, 1  ;;  %p144_p10 = scmp.lt.s32.totalorder %s2308_s18, 3 }
   0xf   : > { %p2403_p11 = por %p131_p7, %p75_p0  ;;  %p2407_p12 = por %p137_p8, %p81_p3 }
  0x10   : > { %p2411_p13 = pnand %p1712_p9, %p144_p10  ;;  %s2310_s30 = smov [#allocation2]  }
  0x11   : > { %s2705_s27 = scalar_select %p2403_p11, 1, 0 }
  0x12   : > { %s2706_s28 = scalar_select %p2407_p12, 1, 0 }
  0x13   : > { %s2707_s29 = scalar_select %p2411_p13, 1, 0 }
  0x14   : > { %p1906_p1 = pneg %p2411_p13  ;;  %s156_s5 = sshll.u32 %s2310_s30, 4  ;;  %s157_s5 = int_to_ptr.vmem [resolvable:$true] %s156_s5 }
  0x15   : > { %p1923_p3 = scmp.lt.s32.totalorder %s2308_s18, 2  ;;  %s2311_s7 = smov [#allocation5]  }
  0x16   : > { %p2419_p2 = pnand %p1906_p1, %p2700_p4  ;;  %s169_s8 = sshll.u32 %s2311_s7, 4  ;;  %s170_s8 = int_to_ptr.vmem [resolvable:$true] %s169_s8 }
  0x17   : > { %s2193_s9 = scalar_lea.vmem %s157_s5, 1024  ;;  %p2201_p12 = scmp.lt.s32.totalorder %s157_s5, %s157_s5 }
  0x18   : > { %p2184_p7 = pneg %p2419_p2  ;;  %p2194_p8 = scmp.ne.s32.totalorder %s157_s5, %s2193_s9 }
  0x19   : > { %p2202_p11 = scmp.lt.s32.totalorder %s2193_s9, %s2193_s9 }
  0x1a   : > { %p2196_p9 = pnand %p2194_p8, %p2184_p7 }
  0x1b   : > { %p2203_p1 = por %p2202_p11, %p2201_p12 }
  0x1c   : > { %p2197_p10 = pneg %p2196_p9 }
  0x1e   : > { %p2204_p4 = pnand %p2203_p1, %p2197_p10 }
  0x20   : > { %2207 = shalt.err (!%p2204_p4)
}
  0x21   : > { %s2312_s10 = smov 512   ;;  %s2313_s11 = smov 32  }
  0x22   : > { %1909 = dma.hbm_to_vmem [thread:$0]  (!%p2419_p2), %s2694_s0, 1024, %s157_s5, [#allocation3], %s2312_s10, %s2312_s10, %s2313_s11  }
  0x23   : > { %p2441_p8 = pnand %p1923_p3, %p2390_p5  ;;  %s2219_s20 = scalar_lea.vmem %s170_s8, 1024 }
  0x24   : > { %p2220_p4 = scmp.ne.s32.totalorder %s170_s8, %s2219_s20  ;;  %p2227_p9 = scmp.lt.s32.totalorder %s170_s8, %s170_s8 }
  0x25   : > { %p2228_p10 = scmp.lt.s32.totalorder %s2219_s20, %s2219_s20 }
  0x26   : > { %p2222_p11 = pnand %p2220_p4, %p2184_p7 }
  0x27   : > { %p2229_p1 = por %p2228_p10, %p2227_p9 }
  0x28   : > { %p2223_p12 = pneg %p2222_p11 }
  0x2a   : > { %p2230_p0 = pnand %p2229_p1, %p2223_p12 }
  0x2c   : > { %2233 = shalt.err (!%p2230_p0)
}
  0x2d   : > { %1912 = dma.hbm_to_vmem [thread:$0]  (!%p2419_p2), %s2695_s1, 1024, %s170_s8, [#allocation6], %s2312_s10, %s2312_s10, %s2313_s11  }
  0x2e   : > { %s183_s25 = sand.u32 1, %s2308_s18   ;;  %s185_s30 = sand.u32 1, %s2304_s17  }
  0x2f   : > { %s1716_s5 = sshll.u32 %s185_s30, 10  ;;  %s1858_s7 = sshll.u32 %s2308_s18, 8 }
  0x30   : > { %s2461_s13 = scalar_lea.hbm %s2696_s2, %s1858_s7  ;;  %s187_s6 = scalar_lea.vmem [#allocation7], %s1716_s5 }
  0x31   : > { %s194_s20 = sshll.u32 %s187_s6, 4  ;;  %s2465_s22 = scalar_lea.sflag [#allocation3], %s183_s25  ;;  %s2463_s20 = int_to_ptr.vmem [resolvable:$true] %s194_s20 }
  0x32   : > { %s2234_s23 = scalar_lea.hbm %s2461_s13, 16384  ;;  %p2236_p2 = pneg %p2441_p8 }
  0x33   : > { %p2235_p5 = scmp.ne.s32.totalorder %s2461_s13, %s2234_s23  ;;  %s2239_s30 = scalar_lea.hbm %s2696_s2, 32768 }
  0x34   : > { %p2240_p7 = scmp.lt.s32.totalorder %s2461_s13, %s2696_s2  ;;  %p2241_p4 = scmp.lt.s32.totalorder %s2239_s30, %s2234_s23 }
  0x35   : > { %p2237_p0 = pnand %p2236_p2, %p2235_p5 }
  0x36   : > { %p2242_p11 = por %p2241_p4, %p2240_p7 }
  0x37   : > { %p2238_p3 = pneg %p2237_p0 }
  0x39   : > { %p2243_p12 = pnand %p2242_p11, %p2238_p3 }
  0x3b   : > { %2246 = shalt.err (!%p2243_p12)
}
  0x3c   : > { %s2247_s25 = scalar_lea.vmem %s2463_s20, 16384  ;;  %s2314_s5 = smov [#allocation7]  }
  0x3d   : > { %p2248_p9 = scmp.ne.s32.totalorder %s2463_s20, %s2247_s25  ;;  %s2252_s12 = sshll.u32 %s2314_s5, 4  ;;  %s2253_s12 = int_to_ptr.vmem [resolvable:$false] %s2252_s12 }
  0x3e   : > { %s2254_s6 = scalar_lea.vmem %s2253_s12, 32768  ;;  %p2255_p5 = scmp.lt.s32.totalorder %s2463_s20, %s2253_s12 }
  0x3f   : > { %p2250_p10 = pnand %p2248_p9, %p2236_p2  ;;  %p2256_p0 = scmp.lt.s32.totalorder %s2254_s6, %s2247_s25 }
  0x41   : > { %p2251_p1 = pneg %p2250_p10  ;;  %p2257_p6 = por %p2256_p0, %p2255_p5 }
  0x43   : > { %p2258_p13 = pnand %p2257_p6, %p2251_p1 }
  0x45   : > { %2261 = shalt.err (!%p2258_p13)
}
  0x46   : > { %s2315_s23 = smov 256   ;;  %s2316_s8 = smov 16  }
  0x47   : > { %1916 = dma.hbm_to_vmem [thread:$0]  (!%p2441_p8), %s2461_s13, 16384, %s2463_s20, %s2465_s22, %s2312_s10, %s2315_s23, %s2316_s8  }
  0x48   : > { %p2710_p2 = scmp.ne.s32.totalorder %s2707_s29, 0 }
  0x49   : > { %p2711_p3 = scmp.eq.s32.totalorder (!%p2710_p2), %s2372_s19, 0 }
  0x4a   : > { %214 = sbr.rel (%p2710_p2) target bundleno = 943 (0x3af), region = 36 }
  0x4f   : > { %2279 = dma.done.wait (%p2711_p3), [#allocation3], 1024   ;;  %p2712_p7 = pmov %p2711_p3 }
  0x50   : > { %p2713_p6 = pmov %p2711_p3 }
  0x51   : > { %2281 = vsyncadd (%p2712_p7), [#allocation3], 4294966272 }
  0x52   : > { %2283 = dma.done.wait (%p2713_p6), [#allocation6], 1024   ;;  %p2714_p13 = pmov %p2711_p3 }
  0x53   : > { %s224_s14 = sand.u32 1, %s2372_s19   ;;  %s2499_s10 = sand.u32 1, %s2300_s16  }
  0x54   : > { %2285 = vsyncadd (%p2714_p13), [#allocation6], 4294966272  ;;  %s1722_s29 = sshll.u32 %s2499_s10, 10  ;;  %s225_s13 = scalar_lea.sflag [#allocation3], %s224_s14 }
  0x55   : > { %s2502_s20 = scalar_lea.vmem [#allocation7], %s1722_s29  ;;  %p2715_p8 = scmp.ne.s32.totalorder %s2704_s26, 0 }
  0x57   : > { %2287 = dma.done.wait (%p2715_p8), %s225_s13, 16384  }
  0x58   : > { %2289 = vsyncadd (%p2715_p8), %s225_s13, 4294950912  ;;  %v1974_v0 = vld [vmem:[%s2502_s20 + $0xe4] ss:$16 sps:$4 sm:$0xff]   ;;  %v1978_v2 = vld [vmem:[%s2502_s20 + $0xe0] ss:$16 sps:$4 sm:$0xff]   ;;  %vm2318_vm0 = vmmov 0  }
  0x59   : > { %v1976_v1 = vld [vmem:[%s2502_s20 + $0x2e4] ss:$16 sps:$4 sm:$0xff]   ;;  %748 = vmatprep.subr.bf16.mxu0 %v1974_v0  ;;  %v1979_v3 = vld [vmem:[%s2502_s20 + $0x2e0] ss:$16 sps:$4 sm:$0xff]   ;;  %v265_v46 = vld [vmem:[#allocation2 + $0x8] sm:$0xff]  ;;  %s1724_s26 = sshll.u32 %s2372_s19, 1 }
  0x5a   : > { %791 = vmatprep.subr.bf16.mxu1 %v1976_v1  ;;  %v1980_v4 = vld [vmem:[%s2502_s20 + $0xc4] ss:$16 sps:$4 sm:$0xff]   ;;  %749 = vmatpush1.bf16.msra.mxu0 %v1978_v2  ;;  %v1984_v6 = vld [vmem:[%s2502_s20 + $0xc0] ss:$16 sps:$4 sm:$0xff]   ;;  %v269_v47 = vld [vmem:[#allocation2 + $0x28] sm:$0xff]  ;;  %p259_p4 = scmp.lt.s32.totalorder %s1724_s26, 3 }
  0x5b   : > { %792 = vmatpush1.bf16.msra.mxu1 %v1979_v3  ;;  %v1982_v5 = vld [vmem:[%s2502_s20 + $0x2c4] ss:$16 sps:$4 sm:$0xff]   ;;  %750 = vmatprep.subr.bf16.mxu0 %v1980_v4  ;;  %v1985_v7 = vld [vmem:[%s2502_s20 + $0x2c0] ss:$16 sps:$4 sm:$0xff]   ;;  %v267_v48 = vld [vmem:[#allocation2 + $0x18] sm:$0xff]  ;;  %v273_v53 = vpack.c.bf16 %v269_v47, %v265_v46  ;;  %vm1524_vm1 = vcmask 64512  }
  0x5c   : > { %793 = vmatprep.subr.bf16.mxu1 %v1982_v5  ;;  %v1986_v8 = vld [vmem:[%s2502_s20 + $0xa4] ss:$16 sps:$4 sm:$0xff]   ;;  %v1990_v10 = vld [vmem:[%s2502_s20 + $0xa0] ss:$16 sps:$4 sm:$0xff]   ;;  %v271_v49 = vld [vmem:[#allocation2 + $0x38] sm:$0xff]  ;;  %s2724_s26 = smov (!%p259_p4, %s1724_s26), 3 }
  0x5d   : > { %v1988_v9 = vld [vmem:[%s2502_s20 + $0x2a4] ss:$16 sps:$4 sm:$0xff]   ;;  %v1991_v11 = vld [vmem:[%s2502_s20 + $0x2a0] ss:$16 sps:$4 sm:$0xff]   ;;  %v275_v54 = vpack.c.bf16 %v271_v49, %v267_v48  ;;  %780 = vmatprep.mubr.bf16.mxu0 %v273_v53  ;;  %v283_v46 = vld [vmem:[#allocation5 + $0x38] sm:$0xff]  ;;  %s261_s30 = scalar_lea.vmem %s2697_s3, %s2724_s26  ;;  %s1723_s7 = sshll.u32 %s2499_s10, 5 }
  0x5e   : > { %751 = vmatpush1.bf16.msra.mxu0 %v1984_v6  ;;  %v1992_v12 = vld [vmem:[%s2502_s20 + $0x84] ss:$16 sps:$4 sm:$0xff]   ;;  %v1996_v14 = vld [vmem:[%s2502_s20 + $0x80] ss:$16 sps:$4 sm:$0xff]   ;;  %v2112_v48 = vld [vmem:[%s2502_s20 + $0x8] ss:$16 sps:$4 sm:$0xff]  }
  0x5f   : > { %794 = vmatpush1.bf16.msra.mxu1 %v1985_v7  ;;  %752 = vmatprep.subr.bf16.mxu0 %v1986_v8  ;;  %v1994_v13 = vld [vmem:[%s2502_s20 + $0x284] ss:$16 sps:$4 sm:$0xff]   ;;  %v1997_v15 = vld [vmem:[%s2502_s20 + $0x280] ss:$16 sps:$4 sm:$0xff]   ;;  %v2115_v49 = vld [vmem:[%s2502_s20 + $0x208] ss:$16 sps:$4 sm:$0xff]  }
  0x60   : > { %795 = vmatprep.subr.bf16.mxu1 %v1988_v9  ;;  %v1998_v16 = vld [vmem:[%s2502_s20 + $0x64] ss:$16 sps:$4 sm:$0xff]   ;;  %v2002_v18 = vld [vmem:[%s2502_s20 + $0x60] ss:$16 sps:$4 sm:$0xff]   ;;  %823 = vmatprep.mubr.bf16.mxu1 %v275_v54  ;;  %v2121_v53 = vld [vmem:[%s2502_s20 + $0x3e8] ss:$16 sps:$4 sm:$0xff]  }
  0x61   : > { %v2000_v17 = vld [vmem:[%s2502_s20 + $0x264] ss:$16 sps:$4 sm:$0xff]   ;;  %v2003_v19 = vld [vmem:[%s2502_s20 + $0x260] ss:$16 sps:$4 sm:$0xff]   ;;  %v2126_v54 = vld [vmem:[%s2502_s20 + $0x1cc] ss:$16 sps:$4 sm:$0xff]  }
  0x62   : > { %753 = vmatpush1.bf16.msra.mxu0 %v1990_v10  ;;  %v2004_v20 = vld [vmem:[%s2502_s20 + $0x44] ss:$16 sps:$4 sm:$0xff]   ;;  %v2008_v22 = vld [vmem:[%s2502_s20 + $0x40] ss:$16 sps:$4 sm:$0xff]   ;;  %v2072_v10 = vld [vmem:[%s2502_s20 + $0xec] ss:$16 sps:$4 sm:$0xff]  }
  0x63   : > { %796 = vmatpush1.bf16.msra.mxu1 %v1991_v11  ;;  %754 = vmatprep.subr.bf16.mxu0 %v1992_v12  ;;  %v2006_v21 = vld [vmem:[%s2502_s20 + $0x244] ss:$16 sps:$4 sm:$0xff]   ;;  %v2009_v23 = vld [vmem:[%s2502_s20 + $0x240] ss:$16 sps:$4 sm:$0xff]   ;;  %v2075_v11 = vld [vmem:[%s2502_s20 + $0x2ec] ss:$16 sps:$4 sm:$0xff]  }
  0x64   : > { %797 = vmatprep.subr.bf16.mxu1 %v1994_v13  ;;  %v2010_v24 = vld [vmem:[%s2502_s20 + $0x24] ss:$16 sps:$4 sm:$0xff]   ;;  %v2014_v26 = vld [vmem:[%s2502_s20 + $0x20] ss:$16 sps:$4 sm:$0xff]   ;;  %s256_s9 = scalar_lea.vmem [#allocation8], %s1723_s7  ;;  %s1574_s25 = scalar_lea.sflag [#allocation4], %s2499_s10 }
  0x65   : > { %v2012_v25 = vld [vmem:[%s2502_s20 + $0x224] ss:$16 sps:$4 sm:$0xff]   ;;  %v2015_v27 = vld [vmem:[%s2502_s20 + $0x220] ss:$16 sps:$4 sm:$0xff]  }
  0x66   : > { %755 = vmatpush1.bf16.msra.mxu0 %v1996_v14  ;;  %v2016_v28 = vld [vmem:[%s2502_s20 + $0x4] ss:$16 sps:$4 sm:$0xff]   ;;  %v2020_v30 = vld [vmem:[%s2502_s20] ss:$16 sps:$4 sm:$0xff]   ;;  %v2070_v14 = vld [vmem:[%s2502_s20 + $0xe8] ss:$16 sps:$4 sm:$0xff]  }
  0x67   : > { %798 = vmatpush1.bf16.msra.mxu1 %v1997_v15  ;;  %756 = vmatprep.subr.bf16.mxu0 %v1998_v16  ;;  %v2018_v29 = vld [vmem:[%s2502_s20 + $0x204] ss:$16 sps:$4 sm:$0xff]   ;;  %v2021_v31 = vld [vmem:[%s2502_s20 + $0x200] ss:$16 sps:$4 sm:$0xff]   ;;  %v2073_v15 = vld [vmem:[%s2502_s20 + $0x2e8] ss:$16 sps:$4 sm:$0xff]  }
  0x68   : > { %799 = vmatprep.subr.bf16.mxu1 %v2000_v17  ;;  %v2022_v32 = vld [vmem:[%s2502_s20 + $0x1e4] ss:$16 sps:$4 sm:$0xff]   ;;  %v2026_v34 = vld [vmem:[%s2502_s20 + $0x1e0] ss:$16 sps:$4 sm:$0xff]   ;;  %v2078_v16 = vld [vmem:[%s2502_s20 + $0xcc] ss:$16 sps:$4 sm:$0xff]  }
  0x69   : > { %v2024_v33 = vld [vmem:[%s2502_s20 + $0x3e4] ss:$16 sps:$4 sm:$0xff]   ;;  %v2027_v35 = vld [vmem:[%s2502_s20 + $0x3e0] ss:$16 sps:$4 sm:$0xff]   ;;  %v2081_v17 = vld [vmem:[%s2502_s20 + $0x2cc] ss:$16 sps:$4 sm:$0xff]  }
  0x6a   : > { %757 = vmatpush1.bf16.msra.mxu0 %v2002_v18  ;;  %v2028_v36 = vld [vmem:[%s2502_s20 + $0x1c4] ss:$16 sps:$4 sm:$0xff]   ;;  %v2032_v38 = vld [vmem:[%s2502_s20 + $0x1c0] ss:$16 sps:$4 sm:$0xff]   ;;  %v2076_v18 = vld [vmem:[%s2502_s20 + $0xc8] ss:$16 sps:$4 sm:$0xff]  }
  0x6b   : > { %800 = vmatpush1.bf16.msra.mxu1 %v2003_v19  ;;  %758 = vmatprep.subr.bf16.mxu0 %v2004_v20  ;;  %v2030_v37 = vld [vmem:[%s2502_s20 + $0x3c4] ss:$16 sps:$4 sm:$0xff]   ;;  %v2033_v39 = vld [vmem:[%s2502_s20 + $0x3c0] ss:$16 sps:$4 sm:$0xff]   ;;  %v2079_v19 = vld [vmem:[%s2502_s20 + $0x2c8] ss:$16 sps:$4 sm:$0xff]  }
  0x6c   : > { %801 = vmatprep.subr.bf16.mxu1 %v2006_v21  ;;  %v2034_v40 = vld [vmem:[%s2502_s20 + $0x1a4] ss:$16 sps:$4 sm:$0xff]   ;;  %v2038_v42 = vld [vmem:[%s2502_s20 + $0x1a0] ss:$16 sps:$4 sm:$0xff]   ;;  %v2084_v20 = vld [vmem:[%s2502_s20 + $0xac] ss:$16 sps:$4 sm:$0xff]  }
  0x6d   : > { %v2036_v41 = vld [vmem:[%s2502_s20 + $0x3a4] ss:$16 sps:$4 sm:$0xff]   ;;  %v2039_v43 = vld [vmem:[%s2502_s20 + $0x3a0] ss:$16 sps:$4 sm:$0xff]   ;;  %v2087_v21 = vld [vmem:[%s2502_s20 + $0x2ac] ss:$16 sps:$4 sm:$0xff]  }
  0x6e   : > { %759 = vmatpush1.bf16.msra.mxu0 %v2008_v22  ;;  %v2040_v44 = vld [vmem:[%s2502_s20 + $0x184] ss:$16 sps:$4 sm:$0xff]   ;;  %v2044_v50 = vld [vmem:[%s2502_s20 + $0x180] ss:$16 sps:$4 sm:$0xff]   ;;  %v2082_v22 = vld [vmem:[%s2502_s20 + $0xa8] ss:$16 sps:$4 sm:$0xff]  }
  0x6f   : > { %802 = vmatpush1.bf16.msra.mxu1 %v2009_v23  ;;  %760 = vmatprep.subr.bf16.mxu0 %v2010_v24  ;;  %v2042_v45 = vld [vmem:[%s2502_s20 + $0x384] ss:$16 sps:$4 sm:$0xff]   ;;  %v2045_v51 = vld [vmem:[%s2502_s20 + $0x380] ss:$16 sps:$4 sm:$0xff]   ;;  %v2085_v23 = vld [vmem:[%s2502_s20 + $0x2a8] ss:$16 sps:$4 sm:$0xff]  }
  0x70   : > { %803 = vmatprep.subr.bf16.mxu1 %v2012_v25  ;;  %v2046_v52 = vld [vmem:[%s2502_s20 + $0x164] ss:$16 sps:$4 sm:$0xff]   ;;  %v2050_v56 = vld [vmem:[%s2502_s20 + $0x160] ss:$16 sps:$4 sm:$0xff]   ;;  %v2090_v24 = vld [vmem:[%s2502_s20 + $0x8c] ss:$16 sps:$4 sm:$0xff]  }
  0x71   : > { %v2048_v55 = vld [vmem:[%s2502_s20 + $0x364] ss:$16 sps:$4 sm:$0xff]   ;;  %v2051_v57 = vld [vmem:[%s2502_s20 + $0x360] ss:$16 sps:$4 sm:$0xff]   ;;  %v2093_v25 = vld [vmem:[%s2502_s20 + $0x28c] ss:$16 sps:$4 sm:$0xff]  }
  0x72   : > { %761 = vmatpush1.bf16.msra.mxu0 %v2014_v26  ;;  %v2052_v58 = vld [vmem:[%s2502_s20 + $0x144] ss:$16 sps:$4 sm:$0xff]   ;;  %v2056_v60 = vld [vmem:[%s2502_s20 + $0x140] ss:$16 sps:$4 sm:$0xff]   ;;  %v2088_v26 = vld [vmem:[%s2502_s20 + $0x88] ss:$16 sps:$4 sm:$0xff]  }
  0x73   : > { %804 = vmatpush1.bf16.msra.mxu1 %v2015_v27  ;;  %762 = vmatprep.subr.bf16.mxu0 %v2016_v28  ;;  %v2054_v59 = vld [vmem:[%s2502_s20 + $0x344] ss:$16 sps:$4 sm:$0xff]   ;;  %v2057_v61 = vld [vmem:[%s2502_s20 + $0x340] ss:$16 sps:$4 sm:$0xff]   ;;  %v2091_v27 = vld [vmem:[%s2502_s20 + $0x288] ss:$16 sps:$4 sm:$0xff]  }
  0x74   : > { %805 = vmatprep.subr.bf16.mxu1 %v2018_v29  ;;  %v2058_v62 = vld [vmem:[%s2502_s20 + $0x124] ss:$16 sps:$4 sm:$0xff]   ;;  %v2062_v0 = vld [vmem:[%s2502_s20 + $0x120] ss:$16 sps:$4 sm:$0xff]   ;;  %v2096_v28 = vld [vmem:[%s2502_s20 + $0x6c] ss:$16 sps:$4 sm:$0xff]  }
  0x75   : > { %v2060_v63 = vld [vmem:[%s2502_s20 + $0x324] ss:$16 sps:$4 sm:$0xff]   ;;  %v2063_v1 = vld [vmem:[%s2502_s20 + $0x320] ss:$16 sps:$4 sm:$0xff]   ;;  %v2099_v29 = vld [vmem:[%s2502_s20 + $0x26c] ss:$16 sps:$4 sm:$0xff]  }
  0x76   : > { %763 = vmatpush1.bf16.msra.mxu0 %v2020_v30  ;;  %v2064_v2 = vld [vmem:[%s2502_s20 + $0x104] ss:$16 sps:$4 sm:$0xff]   ;;  %v2068_v4 = vld [vmem:[%s2502_s20 + $0x100] ss:$16 sps:$4 sm:$0xff]   ;;  %v2094_v30 = vld [vmem:[%s2502_s20 + $0x68] ss:$16 sps:$4 sm:$0xff]  }
  0x77   : > { %806 = vmatpush1.bf16.msra.mxu1 %v2021_v31  ;;  %764 = vmatprep.subr.bf16.mxu0 %v2022_v32  ;;  %v2066_v3 = vld [vmem:[%s2502_s20 + $0x304] ss:$16 sps:$4 sm:$0xff]   ;;  %v2069_v5 = vld [vmem:[%s2502_s20 + $0x300] ss:$16 sps:$4 sm:$0xff]   ;;  %v2097_v31 = vld [vmem:[%s2502_s20 + $0x268] ss:$16 sps:$4 sm:$0xff]  }
  0x78   : > { %807 = vmatprep.subr.bf16.mxu1 %v2024_v33  ;;  %v264_v6 = vld [vmem:[#allocation2] sm:$0xff]  ;;  %v266_v8 = vld [vmem:[#allocation2 + $0x10] sm:$0xff]  ;;  %v2102_v32 = vld [vmem:[%s2502_s20 + $0x4c] ss:$16 sps:$4 sm:$0xff]  }
  0x79   : > { %v268_v7 = vld [vmem:[#allocation2 + $0x20] sm:$0xff]  ;;  %v270_v9 = vld [vmem:[#allocation2 + $0x30] sm:$0xff]  ;;  %v2105_v33 = vld [vmem:[%s2502_s20 + $0x24c] ss:$16 sps:$4 sm:$0xff]  }
  0x7a   : > { %765 = vmatpush2.bf16.msra.mxu0 %v2026_v34  ;;  %v272_v12 = vpack.c.bf16 %v268_v7, %v264_v6  ;;  %v274_v13 = vpack.c.bf16 %v270_v9, %v266_v8  ;;  %v2100_v34 = vld [vmem:[%s2502_s20 + $0x48] ss:$16 sps:$4 sm:$0xff]   ;;  %v2150_v6 = vld [vmem:[%s2502_s20 + $0x14c] ss:$16 sps:$4 sm:$0xff]  }
  0x7b   : > { %808 = vmatpush2.bf16.msra.mxu1 %v2027_v35  ;;  %766 = vmatprep.subr.bf16.mxu0 %v2028_v36  ;;  %v2103_v35 = vld [vmem:[%s2502_s20 + $0x248] ss:$16 sps:$4 sm:$0xff]   ;;  %v2108_v36 = vld [vmem:[%s2502_s20 + $0x2c] ss:$16 sps:$4 sm:$0xff]  }
  0x7c   : > { %809 = vmatprep.subr.bf16.mxu1 %v2030_v37  ;;  %v2111_v37 = vld [vmem:[%s2502_s20 + $0x22c] ss:$16 sps:$4 sm:$0xff]   ;;  %v2148_v8 = vld [vmem:[%s2502_s20 + $0x148] ss:$16 sps:$4 sm:$0xff]  }
  0x7d   : > { %v2153_v7 = vld [vmem:[%s2502_s20 + $0x34c] ss:$16 sps:$4 sm:$0xff]   ;;  %v2151_v9 = vld [vmem:[%s2502_s20 + $0x348] ss:$16 sps:$4 sm:$0xff]  }
  0x7e   : > { %767 = vmatpush2.bf16.msra.mxu0 %v2032_v38  ;;  %v2106_v38 = vld [vmem:[%s2502_s20 + $0x28] ss:$16 sps:$4 sm:$0xff]  }
  0x7f   : > { %810 = vmatpush2.bf16.msra.mxu1 %v2033_v39  ;;  %768 = vmatprep.subr.bf16.mxu0 %v2034_v40  ;;  %v2109_v39 = vld [vmem:[%s2502_s20 + $0x228] ss:$16 sps:$4 sm:$0xff]  }
  0x80   : > { %811 = vmatprep.subr.bf16.mxu1 %v2036_v41  ;;  %v277_v40 = vld [vmem:[#allocation5 + $0x8] sm:$0xff] }
  0x81   : > { %v281_v41 = vld [vmem:[#allocation5 + $0x28] sm:$0xff] }
  0x82   : > { %769 = vmatpush2.bf16.msra.mxu0 %v2038_v42  ;;  %v279_v42 = vld [vmem:[#allocation5 + $0x18] sm:$0xff] }
  0x83   : > { %812 = vmatpush2.bf16.msra.mxu1 %v2039_v43  ;;  %770 = vmatprep.subr.bf16.mxu0 %v2040_v44  ;;  %v2114_v43 = vld [vmem:[%s2502_s20 + $0xc] ss:$16 sps:$4 sm:$0xff]   ;;  %v287_v47 = vpack.c.bf16 %v283_v46, %v279_v42 }
  0x84   : > { %813 = vmatprep.subr.bf16.mxu1 %v2042_v45  ;;  %v2117_v44 = vld [vmem:[%s2502_s20 + $0x20c] ss:$16 sps:$4 sm:$0xff]   ;;  %v285_v45 = vpack.c.bf16 %v281_v41, %v277_v40 }
  0x86   : > { %771 = vmatpush2.bf16.msra.mxu0 %v2044_v50  ;;  %v2120_v50 = vld [vmem:[%s2502_s20 + $0x1ec] ss:$16 sps:$4 sm:$0xff]  }
  0x87   : > { %814 = vmatpush2.bf16.msra.mxu1 %v2045_v51  ;;  %772 = vmatprep.subr.bf16.mxu0 %v2046_v52  ;;  %v2123_v51 = vld [vmem:[%s2502_s20 + $0x3ec] ss:$16 sps:$4 sm:$0xff]   ;;  %v2118_v52 = vld [vmem:[%s2502_s20 + $0x1e8] ss:$16 sps:$4 sm:$0xff]  }
  0x88   : > { %815 = vmatprep.subr.bf16.mxu1 %v2048_v55  ;;  %v2129_v55 = vld [vmem:[%s2502_s20 + $0x3cc] ss:$16 sps:$4 sm:$0xff]  }
  0x8a   : > { %773 = vmatpush2.bf16.msra.mxu0 %v2050_v56  ;;  %v2124_v56 = vld [vmem:[%s2502_s20 + $0x1c8] ss:$16 sps:$4 sm:$0xff]  }
  0x8b   : > { %816 = vmatpush2.bf16.msra.mxu1 %v2051_v57  ;;  %774 = vmatprep.subr.bf16.mxu0 %v2052_v58  ;;  %v2127_v57 = vld [vmem:[%s2502_s20 + $0x3c8] ss:$16 sps:$4 sm:$0xff]   ;;  %v2132_v58 = vld [vmem:[%s2502_s20 + $0x1ac] ss:$16 sps:$4 sm:$0xff]  }
  0x8c   : > { %817 = vmatprep.subr.bf16.mxu1 %v2054_v59  ;;  %v2135_v59 = vld [vmem:[%s2502_s20 + $0x3ac] ss:$16 sps:$4 sm:$0xff]  }
  0x8e   : > { %775 = vmatpush2.bf16.msra.mxu0 %v2056_v60  ;;  %v2130_v60 = vld [vmem:[%s2502_s20 + $0x1a8] ss:$16 sps:$4 sm:$0xff]  }
  0x8f   : > { %818 = vmatpush2.bf16.msra.mxu1 %v2057_v61  ;;  %776 = vmatprep.subr.bf16.mxu0 %v2058_v62  ;;  %v2133_v61 = vld [vmem:[%s2502_s20 + $0x3a8] ss:$16 sps:$4 sm:$0xff]   ;;  %v2138_v62 = vld [vmem:[%s2502_s20 + $0x18c] ss:$16 sps:$4 sm:$0xff]  }
  0x90   : > { %819 = vmatprep.subr.bf16.mxu1 %v2060_v63  ;;  %v2141_v63 = vld [vmem:[%s2502_s20 + $0x38c] ss:$16 sps:$4 sm:$0xff]  }
  0x92   : > { %777 = vmatpush2.bf16.msra.mxu0 %v2062_v0  ;;  %v2136_v0 = vld [vmem:[%s2502_s20 + $0x188] ss:$16 sps:$4 sm:$0xff]  }
  0x93   : > { %820 = vmatpush2.bf16.msra.mxu1 %v2063_v1  ;;  %778 = vmatprep.subr.bf16.mxu0 %v2064_v2  ;;  %v2139_v1 = vld [vmem:[%s2502_s20 + $0x388] ss:$16 sps:$4 sm:$0xff]   ;;  %v2144_v2 = vld [vmem:[%s2502_s20 + $0x16c] ss:$16 sps:$4 sm:$0xff]  }
  0x94   : > { %821 = vmatprep.subr.bf16.mxu1 %v2066_v3  ;;  %v2147_v3 = vld [vmem:[%s2502_s20 + $0x36c] ss:$16 sps:$4 sm:$0xff]  }
  0x96   : > { %779 = vmatpush2.bf16.msra.mxu0 %v2068_v4  ;;  %v2142_v4 = vld [vmem:[%s2502_s20 + $0x168] ss:$16 sps:$4 sm:$0xff]  }
  0x97   : > { %822 = vmatpush2.bf16.msra.mxu1 %v2069_v5  ;;  %1154 = vmatprep.subr.bf16.mxu0 %v2072_v10  ;;  %v2145_v5 = vld [vmem:[%s2502_s20 + $0x368] ss:$16 sps:$4 sm:$0xff]   ;;  %v2156_v10 = vld [vmem:[%s2502_s20 + $0x12c] ss:$16 sps:$4 sm:$0xff]  }
  0x98   : > { %1197 = vmatprep.subr.bf16.mxu1 %v2075_v11  ;;  %v2159_v11 = vld [vmem:[%s2502_s20 + $0x32c] ss:$16 sps:$4 sm:$0xff]  }
  0x99   : > { %781 = vmatmul.mubr.bf16.vlgmr.msra.gmra.mxu0 %v272_v12  ;;  %v2154_v12 = vld [vmem:[%s2502_s20 + $0x128] ss:$16 sps:$4 sm:$0xff]  }
  0x9a   : > { %824 = vmatmul.mubr.bf16.vlgmr.msra.gmra.mxu1 %v274_v13  ;;  %1155 = vmatpush1.bf16.msra.mxu0 %v2070_v14  ;;  %v2157_v13 = vld [vmem:[%s2502_s20 + $0x328] ss:$16 sps:$4 sm:$0xff]   ;;  %v2162_v14 = vld [vmem:[%s2502_s20 + $0x10c] ss:$16 sps:$4 sm:$0xff]  }
  0x9b   : > { %1198 = vmatpush1.bf16.msra.mxu1 %v2073_v15  ;;  %1156 = vmatprep.subr.bf16.mxu0 %v2078_v16  ;;  %v2165_v15 = vld [vmem:[%s2502_s20 + $0x30c] ss:$16 sps:$4 sm:$0xff]   ;;  %v2160_v16 = vld [vmem:[%s2502_s20 + $0x108] ss:$16 sps:$4 sm:$0xff]  }
  0x9c   : > { %1199 = vmatprep.subr.bf16.mxu1 %v2081_v17  ;;  %1186 = vmatprep.mubr.bf16.mxu0 %v285_v45  ;;  %v2163_v17 = vld [vmem:[%s2502_s20 + $0x308] ss:$16 sps:$4 sm:$0xff]  }
  0x9d   : > { %1229 = vmatprep.mubr.bf16.mxu1 %v287_v47 }
  0x9e   : > { %1157 = vmatpush1.bf16.msra.mxu0 %v2076_v18  ;;  %v276_v18 = vld [vmem:[#allocation5] sm:$0xff] }
  0x9f   : > { %1200 = vmatpush1.bf16.msra.mxu1 %v2079_v19  ;;  %1158 = vmatprep.subr.bf16.mxu0 %v2084_v20  ;;  %v280_v19 = vld [vmem:[#allocation5 + $0x20] sm:$0xff]  ;;  %v278_v20 = vld [vmem:[#allocation5 + $0x10] sm:$0xff] }
  0xa0   : > { %1201 = vmatprep.subr.bf16.mxu1 %v2087_v21  ;;  %v282_v21 = vld [vmem:[#allocation5 + $0x30] sm:$0xff] }
  0xa2   : > { %1159 = vmatpush1.bf16.msra.mxu0 %v2082_v22  ;;  %v284_v22 = vpack.c.bf16 %v280_v19, %v276_v18 }
  0xa3   : > { %1202 = vmatpush1.bf16.msra.mxu1 %v2085_v23  ;;  %1160 = vmatprep.subr.bf16.mxu0 %v2090_v24  ;;  %v286_v23 = vpack.c.bf16 %v282_v21, %v278_v20  ;;  %v2317_v24 = vmov 0.0  }
  0xa4   : > { %1203 = vmatprep.subr.bf16.mxu1 %v2093_v25  ;;  %v418_v25 = vlaneseq }
  0xa6   : > { %1161 = vmatpush1.bf16.msra.mxu0 %v2088_v26 }
  0xa7   : > { %1204 = vmatpush1.bf16.msra.mxu1 %v2091_v27  ;;  %1162 = vmatprep.subr.bf16.mxu0 %v2096_v28  ;;  %v419_v28 = vshrl.u32 %v418_v25, 7 }
  0xa8   : > { %1205 = vmatprep.subr.bf16.mxu1 %v2099_v29 }
  0xaa   : > { %1163 = vmatpush1.bf16.msra.mxu0 %v2094_v30 }
  0xab   : > { %1206 = vmatpush1.bf16.msra.mxu1 %v2097_v31  ;;  %1164 = vmatprep.subr.bf16.mxu0 %v2102_v32  ;;  %v420_v31 = vsub.s32 0, %v419_v28  ;;  %v416_v32 = vld [vmem:[%s261_s30] sm:$0x3] }
  0xac   : > { %1207 = vmatprep.subr.bf16.mxu1 %v2105_v33  ;;  %v424_v33 = vsub.s32 1, %v419_v28 }
  0xae   : > { %1165 = vmatpush1.bf16.msra.mxu0 %v2100_v34 }
  0xaf   : > { %1208 = vmatpush1.bf16.msra.mxu1 %v2103_v35  ;;  %1166 = vmatprep.subr.bf16.mxu0 %v2108_v36  ;;  %v421_v36 = vrot.slane %v416_v32, %v420_v31 }
  0xb0   : > { %1209 = vmatprep.subr.bf16.mxu1 %v2111_v37  ;;  %v425_v37 = vrot.slane %v416_v32, %v424_v33 }
  0xb2   : > { %1167 = vmatpush1.bf16.msra.mxu0 %v2106_v38 }
  0xb3   : > { %1210 = vmatpush1.bf16.msra.mxu1 %v2109_v39  ;;  %1168 = vmatprep.subr.bf16.mxu0 %v2114_v43 }
  0xb4   : > { %1211 = vmatprep.subr.bf16.mxu1 %v2117_v44 }
  0xb6   : > { %1169 = vmatpush1.bf16.msra.mxu0 %v2112_v48 }
  0xb7   : > { %1212 = vmatpush1.bf16.msra.mxu1 %v2115_v49  ;;  %1170 = vmatprep.subr.bf16.mxu0 %v2120_v50 }
  0xb8   : > { %1213 = vmatprep.subr.bf16.mxu1 %v2123_v51 }
  0xba   : > { %1171 = vmatpush2.bf16.msra.mxu0 %v2118_v52 }
  0xbb   : > { %1214 = vmatpush2.bf16.msra.mxu1 %v2121_v53  ;;  %1172 = vmatprep.subr.bf16.mxu0 %v2126_v54 }
  0xbc   : > { %1215 = vmatprep.subr.bf16.mxu1 %v2129_v55 }
  0xbe   : > { %1173 = vmatpush2.bf16.msra.mxu0 %v2124_v56 }
  0xbf   : > { %1216 = vmatpush2.bf16.msra.mxu1 %v2127_v57  ;;  %1174 = vmatprep.subr.bf16.mxu0 %v2132_v58 }
  0xc0   : > { %1217 = vmatprep.subr.bf16.mxu1 %v2135_v59 }
  0xc2   : > { %1175 = vmatpush2.bf16.msra.mxu0 %v2130_v60 }
  0xc3   : > { %1218 = vmatpush2.bf16.msra.mxu1 %v2133_v61  ;;  %1176 = vmatprep.subr.bf16.mxu0 %v2138_v62 }
  0xc4   : > { %1219 = vmatprep.subr.bf16.mxu1 %v2141_v63 }
  0xc6   : > { %1177 = vmatpush2.bf16.msra.mxu0 %v2136_v0 }
  0xc7   : > { %1220 = vmatpush2.bf16.msra.mxu1 %v2139_v1  ;;  %1178 = vmatprep.subr.bf16.mxu0 %v2144_v2 }
  0xc8   : > { %1221 = vmatprep.subr.bf16.mxu1 %v2147_v3 }
  0xca   : > { %1179 = vmatpush2.bf16.msra.mxu0 %v2142_v4 }
  0xcb   : > { %1222 = vmatpush2.bf16.msra.mxu1 %v2145_v5  ;;  %1180 = vmatprep.subr.bf16.mxu0 %v2150_v6 }
  0xcc   : > { %1223 = vmatprep.subr.bf16.mxu1 %v2153_v7 }
  0xce   : > { %1181 = vmatpush2.bf16.msra.mxu0 %v2148_v8 }
  0xcf   : > { %1224 = vmatpush2.bf16.msra.mxu1 %v2151_v9  ;;  %1182 = vmatprep.subr.bf16.mxu0 %v2156_v10 }
  0xd0   : > { %1225 = vmatprep.subr.bf16.mxu1 %v2159_v11 }
  0xd2   : > { %1183 = vmatpush2.bf16.msra.mxu0 %v2154_v12 }
  0xd3   : > { %1226 = vmatpush2.bf16.msra.mxu1 %v2157_v13  ;;  %1184 = vmatprep.subr.bf16.mxu0 %v2162_v14 }
  0xd4   : > { %1227 = vmatprep.subr.bf16.mxu1 %v2165_v15 }
  0xd6   : > { %1185 = vmatpush2.bf16.msra.mxu0 %v2160_v16 }
  0xd7   : > { %1228 = vmatpush2.bf16.msra.mxu1 %v2163_v17  ;;  %1868 = vmatprep.subr.mxu0 %v2317_v24 }
  0xd8   : > { %1873 = vmatprep.subr.mxu1 %v2317_v24 }
  0xd9   : > { %1187 = vmatmul.mubr.bf16.vlgmr.msra.gmra.mxu0 %v284_v22 }
  0xda   : > { %1230 = vmatmul.mubr.bf16.vlgmr.msra.gmra.mxu1 %v286_v23  ;;  %1870 = vmatprep.mubr.msk.f32.mxu0 %vm2318_vm0, %v2317_v24 }
  0xdb   : > { %1875 = vmatprep.mubr.msk.f32.mxu1 %vm2318_vm0, %v2317_v24 }
 0x159   : > { %v782_v26 = vpop.f32.mrf.mxu0 }
 0x15a   : > { %v825_v27 = vpop.f32.mrf.mxu1  ;;  %v783_v40 = vadd.f32 %v782_v26, %v421_v36 }
 0x15b   : > { %v784_v29 = vpop.f32.mrf.mxu0 }
 0x15c   : > { %v827_v30 = vpop.f32.mrf.mxu1  ;;  %v785_v44 = vadd.f32 %v784_v29, %v425_v37  ;;  %v826_v48 = vadd.f32 %v825_v27, %v783_v40 }
 0x15d   : > { %v786_v34 = vpop.f32.mrf.mxu0 }
 0x15e   : > { %v829_v35 = vpop.f32.mrf.mxu1  ;;  %v787_v49 = vadd.f32 %v786_v34, %v421_v36  ;;  %v828_v53 = vadd.f32 %v827_v30, %v785_v44 }
 0x15f   : > { %v788_v38 = vpop.f32.mrf.mxu0 }
 0x160   : > { %v831_v39 = vpop.f32.mrf.mxu1  ;;  %v789_v54 = vadd.f32 %v788_v38, %v425_v37  ;;  %v830_v58 = vadd.f32 %v829_v35, %v787_v49 }
 0x162   : > { %v832_v59 = vadd.f32 %v831_v39, %v789_v54 }
 0x199   : > { %v1188_v41 = vpop.f32.mrf.mxu0 }
 0x19a   : > { %v1231_v42 = vpop.f32.mrf.mxu1 }
 0x19b   : > { %v1232_v43 = vadd.f32 %v1231_v42, %v1188_v41  ;;  %v1190_v45 = vpop.f32.mrf.mxu0 }
 0x19c   : > { %v1233_v46 = vpop.f32.mrf.mxu1 }
 0x19d   : > { %v1234_v47 = vadd.f32 %v1233_v46, %v1190_v45  ;;  %1869 = vmatpush3.xpose.msra.mxu0 %v1232_v43  ;;  %v1192_v50 = vpop.f32.mrf.mxu0 }
 0x19e   : > { %v1235_v51 = vpop.f32.mrf.mxu1  ;;  %1878 = vmatprep.subr.mxu0 %v2317_v24 }
 0x19f   : > { %v1236_v52 = vadd.f32 %v1235_v51, %v1192_v50  ;;  %1874 = vmatpush3.xpose.msra.mxu1 %v1234_v47  ;;  %v1194_v55 = vpop.f32.mrf.mxu0 }
 0x1a0   : > { %v1237_v56 = vpop.f32.mrf.mxu1  ;;  %1871 = vmatmul.mubr.f32.vlgmr.msra.gmra.mxu0 %v826_v48  ;;  %1883 = vmatprep.subr.mxu1 %v2317_v24 }
 0x1a1   : > { %v1238_v57 = vadd.f32 %v1237_v56, %v1194_v55  ;;  %1879 = vmatpush3.xpose.msra.mxu0 %v1236_v52  ;;  %1880 = vmatprep.mubr.msk.f32.mxu0 %vm2318_vm0, %v2317_v24 }
 0x1a2   : > { %1876 = vmatmul.mubr.f32.vlgmr.msra.gmra.mxu1 %v828_v53 }
 0x1a3   : > { %1884 = vmatpush3.xpose.msra.mxu1 %v1238_v57  ;;  %1885 = vmatprep.mubr.msk.f32.mxu1 %vm2318_vm0, %v2317_v24 }
 0x1a4   : > { %1881 = vmatmul.mubr.f32.vlgmr.msra.gmra.mxu0 %v830_v58 }
 0x1a6   : > { %1886 = vmatmul.mubr.f32.vlgmr.msra.gmra.mxu1 %v832_v59 }
 0x260   : > { %v1306_v60 = vpop.f32.mrf.mxu0 }
 0x261   : > { %v1310_v61 = vmul.f32 0.125, %v1306_v60 }
 0x262   : > { %v1872_v62 = vpop.f32.mrf.mxu0  ;;  %v1377_v63 = vpop.f32.mrf.mxu1 }
 0x263   : > { %v1381_v0 = vmul.f32 0.125, %v1377_v63  ;;  %v1525_v1 = vsel %vm1524_vm1, %v1310_v61, -inf }
 0x264   : > { %v1877_v2 = vpop.f32.mrf.mxu1  ;;  %1526 = vmax.xlane.f32.xlu0 %v1525_v1  ;;  %v1448_v3 = vpop.f32.mrf.mxu0 }
 0x265   : > { %v1452_v4 = vmul.f32 0.125, %v1448_v3  ;;  %v1528_v8 = vsel %vm1524_vm1, %v1381_v0, -inf }
 0x266   : > { %v1882_v5 = vpop.f32.mrf.mxu0  ;;  %v1519_v6 = vpop.f32.mrf.mxu1 }
 0x267   : > { %v1523_v7 = vmul.f32 0.125, %v1519_v6  ;;  %v1531_v9 = vsel %vm1524_vm1, %v1452_v4, -inf }
 0x268   : > { %v1887_v10 = vpop.f32.mrf.mxu1  ;;  %1529 = vmax.xlane.f32.xlu0 %v1528_v8  ;;  %1532 = vmax.xlane.f32.xlu1 %v1531_v9 }
 0x269   : > { %v1534_v11 = vsel %vm1524_vm1, %v1523_v7, -inf }
 0x26c   : > { %1535 = vmax.xlane.f32.xlu1 %v1534_v11 }
 0x2ed   : > { %v1527_v12 = vpop.xlane.xlu0 %1526 }
 0x2ee   : > { %v1537_v13 = vsub.f32 %v1310_v61, %v1527_v12 }
 0x2f0   : > { %v1541_v14 = vmul.f32 1.442695, %v1537_v13 }
 0x2f1   : > { %v1530_v15 = vpop.xlane.xlu0 %1529  ;;  %v1533_v16 = vpop.xlane.xlu1 %1532 }
 0x2f2   : > { %2166 = vpow2.f32 %v1541_v14  ;;  %v1538_v17 = vsub.f32 %v1381_v0, %v1530_v15  ;;  %v1539_v18 = vsub.f32 %v1452_v4, %v1533_v16 }
 0x2f4   : > { %v1543_v19 = vmul.f32 1.442695, %v1538_v17  ;;  %v1545_v20 = vmul.f32 1.442695, %v1539_v18 }
 0x2f5   : > { %v1536_v21 = vpop.xlane.xlu1 %1535 }
 0x2f6   : > { %2168 = vpow2.f32 %v1543_v19  ;;  %v1540_v22 = vsub.f32 %v1523_v7, %v1536_v21 }
 0x2f7   : > { %2170 = vpow2.f32 %v1545_v20 }
 0x2f8   : > { %v1547_v23 = vmul.f32 1.442695, %v1540_v22 }
 0x2fa   : > { %2172 = vpow2.f32 %v1547_v23 }
 0x2ff   : > { %v2167_v24 = vpop.eup %2166 }
 0x300   : > { %v1549_v25 = vsel %vm1524_vm1, %v2167_v24, 0.0 }
 0x301   : > { %1550 = vadd.xlane.f32.xlu0 %v1549_v25 }
 0x303   : > { %v2169_v26 = vpop.eup %2168 }
 0x304   : > { %v2171_v27 = vpop.eup %2170  ;;  %v1552_v28 = vsel %vm1524_vm1, %v2169_v26, 0.0 }
 0x305   : > { %1553 = vadd.xlane.f32.xlu1 %v1552_v28  ;;  %v1555_v29 = vsel %vm1524_vm1, %v2171_v27, 0.0 }
 0x306   : > { %1556 = vadd.xlane.f32.xlu0 %v1555_v29 }
 0x307   : > { %v2173_v30 = vpop.eup %2172 }
 0x308   : > { %v1558_v31 = vsel %vm1524_vm1, %v2173_v30, 0.0 }
 0x309   : > { %1559 = vadd.xlane.f32.xlu1 %v1558_v31 }
 0x38a   : > { %v1551_v32 = vpop.xlane.xlu0 %1550 }
 0x38b   : > { %2174 = vrcp.f32 %v1551_v32 }
 0x38e   : > { %v1554_v33 = vpop.xlane.xlu1 %1553 }
 0x38f   : > { %v1557_v34 = vpop.xlane.xlu0 %1556  ;;  %2176 = vrcp.f32 %v1554_v33 }
 0x390   : > { %2178 = vrcp.f32 %v1557_v34 }
 0x392   : > { %v1560_v35 = vpop.xlane.xlu1 %1559 }
 0x393   : > { %2180 = vrcp.f32 %v1560_v35 }
 0x398   : > { %v2175_v36 = vpop.eup %2174 }
 0x399   : > { %v1562_v37 = vmul.f32 %v2175_v36, %v2167_v24 }
 0x39b   : > { %1569 = vst.msk [vmem:[%s256_s9] sm:$0xff] %vm1524_vm1, %v1562_v37 }
 0x39c   : > { %v2177_v38 = vpop.eup %2176 }
 0x39d   : > { %v2179_v39 = vpop.eup %2178  ;;  %v1564_v40 = vmul.f32 %v2177_v38, %v2169_v26 }
 0x39e   : > { %v1566_v41 = vmul.f32 %v2179_v39, %v2171_v27 }
 0x39f   : > { %1570 = vst.msk [vmem:[%s256_s9 + $0x8] sm:$0xff] %vm1524_vm1, %v1564_v40 }
 0x3a0   : > { %v2181_v42 = vpop.eup %2180  ;;  %1571 = vst.msk [vmem:[%s256_s9 + $0x10] sm:$0xff] %vm1524_vm1, %v1566_v41 }
 0x3a1   : > { %v1568_v43 = vmul.f32 %v2181_v42, %v2173_v30 }
 0x3a3   : > { %1572 = vst.msk [vmem:[%s256_s9 + $0x18] sm:$0xff] %vm1524_vm1, %v1568_v43 }
 0x3a4   : > { %s1859_s5 = sshll.u32 %s2372_s19, 8  ;;  %s1597_s12 = sshll.u32 %s256_s9, 4  ;;  %s1598_s12 = int_to_ptr.vmem [resolvable:$true] %s1597_s12 }
 0x3a5   : > { %s1586_s8 = scalar_lea.hbm %s2698_s4, %s1859_s5  ;;  %s2319_s14 = smov 256  }
 0x3a6   : > { %p2716_p11 = scmp.ne.s32.totalorder %s2705_s27, 0  ;;  %s2320_s29 = smov 512  }
 0x3a7   : > { %s2321_s10 = smov 2   ;;  %s2322_s13 = smov 128  }
 0x3a8   : > { %1898 = sst [smem:[#allocation10]] (%p2716_p11), %s2319_s14  ;;  %s2323_s19 = smov 8  }
 0x3a9   : > { %1899 = sst [smem:[#allocation10 + $0x1]] (%p2716_p11), %s2320_s29  ;;  %s2324_s20 = smov 131072  }
 0x3aa   : > { %1900 = sst [smem:[#allocation10 + $0x2]] (%p2716_p11), %s2321_s10  ;;  %s2325_s26 = smov 0  }
 0x3ab   : > { %1901 = sst [smem:[#allocation10 + $0x3]] (%p2716_p11), %s2322_s13 }
 0x3ac   : > { %1902 = sst [smem:[#allocation10 + $0x4]] (%p2716_p11), %s2322_s13 }
 0x3ad   : > { %1903 = sst [smem:[#allocation10 + $0x5]] (%p2716_p11), %s2323_s19 }
 0x3ae   : > { %1904 = dma.general (%p2716_p11), %s1598_s12, 512, %s1586_s8, %s1574_s25, %s2324_s20, [#allocation10], %s2325_s26, 0  }
 0x3af PF: > { %s1625_s22 = sand.u32 1, %s2296_s15   ;;  %p2717_p12 = scmp.ne.s32.totalorder %s2706_s28, 0 }
 0x3b0   : > { %p2718_p9 = scmp.ge.s32.totalorder %s2308_s18, 2  ;;  %s1626_s11 = scalar_lea.sflag [#allocation4], %s1625_s22 }
 0x3b2   : > { %p1918_p10 = pnand %p2718_p9, %p2717_p12 }
 0x3b4   : > { %p1919_p1 = pneg %p1918_p10 }
 0x3b6   : > { %2291 = dma.done.wait (%p1919_p1), %s1626_s11, 512  }
 0x3b7   : > { %2293 = vsyncadd (%p1919_p1), %s1626_s11, 4294966784  ;;  %p16_p5 = scmp.ge.s32.totalorder %s2376_s21, 4   ;;  %s2719_s15 = smov %s2300_s16 }
 0x3b8   : > { %s2720_s16 = smov %s2304_s17  ;;  %s2721_s17 = smov %s2388_s24 }
 0x3b9   : > { %s2722_s18 = smov %s2376_s21  ;;  %18 = sbr.rel (!%p16_p5) target bundleno = 5 (0x5), region = 96 }
 0x3be   :  { %1631 = vsyncpa [#allocation3], 1 }
 0x3bf   :  { %1633 = vsyncpa [#allocation3 + $0x1], 1 }
 0x3c0   :  { %1634 = vsyncpa [#allocation6], 1 }
 0x3c1   :  { %1635 = vsyncpa [#allocation4], 1 }
 0x3c2   :  { %1637 = vsyncpa [#allocation4 + $0x1], 1 }

</bundles_post_ra>
